<compile_context>
chip_gen: v7x
topology: tpu7x:2x2x1
jax: 0.10.0
libtpu: 0.0.40
codegen_flags: <defaults>
</compile_context>

<pallas_src>
import math

import jax
import jax.numpy as jnp
from jax.experimental import pallas as pl
from jax.experimental.pallas import tpu as pltpu


def _round_up(x: int, m: int) -> int:
    return ((x + m - 1) // m) * m


# --------------------------------------------------------------------------
# Kernels
# --------------------------------------------------------------------------

def _mm_kernel_single_k(a_ref, b_ref, o_ref):
    # Whole reduction in one block: no accumulator, no branches.
    o_ref[...] = jnp.dot(
        a_ref[...], b_ref[...], preferred_element_type=jnp.float32
    ).astype(o_ref.dtype)


def _mm_kernel_multi_k(a_ref, b_ref, o_ref):
    # f32 output block is resident across the (last, "arbitrary") k axis:
    # accumulate directly into it; no scratch, no final astype copy.
    @pl.when(pl.program_id(2) == 0)
    def _init():
        o_ref[...] = jnp.zeros_like(o_ref)

    o_ref[...] += jnp.dot(
        a_ref[...], b_ref[...], preferred_element_type=jnp.float32
    )


# --------------------------------------------------------------------------
# Tiled matmul wrapper (f32 output)
# --------------------------------------------------------------------------

# Safe across generations: v7x has 64 MiB VMEM / TC, v5e/v6e have 128 MiB.
_VMEM_TILE_BUDGET = 40 * 1024 * 1024


def _tile_footprint(tm, tk, tn, in_itemsize, out_itemsize):
    # double-buffered A, B inputs + double-buffered output block
    return 2 * (tm * tk + tk * tn) * in_itemsize + 2 * tm * tn * out_itemsize


def _select_tiles(M, K, N, in_itemsize, sublane):
    """Pick (tm, tk, tn) maximizing arithmetic intensity within the VMEM budget."""
    Mal = _round_up(M, sublane)
    Kal = _round_up(K, 128)
    Nal = _round_up(N, 128)
    for t in (1024, 768, 512, 384, 256, 128):
        tm = min(t, Mal)
        tn = min(t, Nal)
        # Prefer collapsing the reduction into a single block when K is moderate.
        if Kal <= 4096 and _tile_footprint(tm, Kal, tn, in_itemsize, 4) <= _VMEM_TILE_BUDGET:
            return tm, Kal, tn
        for tk in (512, 256, 128):
            tkc = min(tk, Kal)
            if _tile_footprint(tm, tkc, tn, in_itemsize, 4) <= _VMEM_TILE_BUDGET:
                return tm, tkc, tn
    return min(128, Mal), min(128, Kal), min(128, Nal)


def _tiled_matmul_f32(a: jax.Array, b: jax.Array, *, tm: int, tn: int, tk: int) -> jax.Array:
    """(M,K) @ (K,N) -> f32 (M,N). M%tm == N%tn == K%tk == 0."""
    M, K = a.shape
    K2, N = b.shape
    assert K == K2
    assert M % tm == 0 and N % tn == 0 and K % tk == 0

    in_itemsize = jnp.dtype(a.dtype).itemsize
    gi, gj, gk = M // tm, N // tn, K // tk

    # Real traffic: A is re-read per j-block, B per i-block, output written once.
    cost = pl.CostEstimate(
        flops=2 * M * N * K,
        transcendentals=0,
        bytes_accessed=(M * K * gj + K * N * gi) * in_itemsize + M * N * 4,
    )

    footprint = _tile_footprint(tm, tk, tn, in_itemsize, 4)
    vmem_limit = int(min(max(footprint + (16 << 20), 32 << 20), 48 << 20))

    if gk == 1:
        grid = (gi, gj)
        in_specs = [
            pl.BlockSpec((tm, tk), lambda i, j: (i, 0)),
            pl.BlockSpec((tk, tn), lambda i, j: (0, j)),
        ]
        out_specs = pl.BlockSpec((tm, tn), lambda i, j: (i, j))
        kernel = _mm_kernel_single_k
        dims = ("parallel", "parallel")
    else:
        grid = (gi, gj, gk)
        in_specs = [
            pl.BlockSpec((tm, tk), lambda i, j, k: (i, k)),
            pl.BlockSpec((tk, tn), lambda i, j, k: (k, j)),
        ]
        out_specs = pl.BlockSpec((tm, tn), lambda i, j, k: (i, j))
        kernel = _mm_kernel_multi_k
        dims = ("parallel", "parallel", "arbitrary")

    return pl.pallas_call(
        kernel,
        out_shape=jax.ShapeDtypeStruct((M, N), jnp.float32),
        grid_spec=pltpu.PrefetchScalarGridSpec(
            num_scalar_prefetch=0,
            grid=grid,
            in_specs=in_specs,
            out_specs=out_specs,
        ),
        compiler_params=pltpu.CompilerParams(
            dimension_semantics=dims,
            vmem_limit_bytes=vmem_limit,
        ),
        cost_estimate=cost,
    )(a, b)


# --------------------------------------------------------------------------
# FourVecLinear forward
# --------------------------------------------------------------------------

def fourvec_linear(x: jax.Array, weight: jax.Array, *, compute_dtype=None) -> jax.Array:
    """out = einsum('oi,bif->bof', weight, x)   (FourVecLinear.forward).

    compute_dtype=jnp.bfloat16 casts the GEMM operands for native-MXU speed
    (accumulation stays f32); default None keeps full f32 numerics.
    """
    B, I, F = x.shape
    O, I_w = weight.shape
    assert I == I_w, "in_features mismatch"

    out_dtype = x.dtype

    # Skinny-M operand swap: M = B*F is tiny for small batches; put O on the
    # MXU row dimension instead so the systolic array is actually occupied.
    swap = (B * F < 128) and (O >= 128)

    # Layout plumbing (outside the kernel). NOTE: in a stacked model, keep the
    # activation in the GEMM layout between layers and pre-transpose the
    # (constant) weight once to avoid per-call HBM relayout passes.
    if not swap:
        a = jnp.transpose(x, (0, 2, 1)).reshape(B * F, I)    # (B*F, I)
        bm = jnp.transpose(weight, (1, 0))                   # (I, O)
    else:
        a = weight                                           # (O, I)
        bm = jnp.transpose(x, (1, 0, 2)).reshape(I, B * F)   # (I, B*F)

    if compute_dtype is not None:
        a = a.astype(compute_dtype)
        bm = bm.astype(compute_dtype)

    sublane = 16 if jnp.dtype(a.dtype) == jnp.dtype(jnp.bfloat16) else 8
    in_itemsize = jnp.dtype(a.dtype).itemsize

    M, K = a.shape
    _, N = bm.shape

    tm, tk, tn = _select_tiles(M, K, N, in_itemsize, sublane)

    # Dual-TC (v7x) heuristic: avoid a degenerate (1,1[,k]) grid where one
    # TensorCore idles, when the problem is big enough to split.
    Mal = _round_up(M, sublane)
    Nal = _round_up(N, 128)
    if pl.cdiv(M, tm) == 1 and pl.cdiv(N, tn) == 1:
        if Nal >= 256:
            tn = _round_up(Nal // 2, 128)
        elif Mal >= 2 * sublane:
            tm = _round_up(Mal // 2, sublane)

    Mp = _round_up(M, tm)
    Kp = _round_up(K, tk)
    Np = _round_up(N, tn)

    # Zero padding is exact for matmul; padded rows/cols are sliced off below.
    if (Mp, Kp) != (M, K):
        a = jnp.pad(a, ((0, Mp - M), (0, Kp - K)))
    if (Kp, Np) != (K, N):
        bm = jnp.pad(bm, ((0, Kp - K), (0, Np - N)))

    out = _tiled_matmul_f32(a, bm, tm=tm, tn=tn, tk=tk)[:M, :N]

    if not swap:
        # (B*F, O) -> (B, F, O) -> (B, O, F)
        res = jnp.transpose(out.reshape(B, F, O), (0, 2, 1))
    else:
        # (O, B*F) -> (O, B, F) -> (B, O, F)
        res = jnp.transpose(out.reshape(O, B, F), (1, 0, 2))
    return res.astype(out_dtype)


def init_weight(key, out_features: int, in_features: int, dtype=jnp.float32):
    # Matches nn.init.kaiming_uniform_(w, a=sqrt(5)):
    #   bound = 1 / sqrt(fan_in)
    bound = 1.0 / math.sqrt(in_features)
    return jax.random.uniform(
        key, (out_features, in_features), dtype=dtype, minval=-bound, maxval=bound
    )


if __name__ == "__main__":
    key = jax.random.PRNGKey(0)
    k_w, k_x, k_w2, k_x2, k_a, k_b = jax.random.split(key, 6)

    # --- main check: module-sized shapes -----------------------------------
    batch, in_features, out_features = 2, 32, 16
    weight = init_weight(k_w, out_features, in_features)
    x = jax.random.normal(k_x, (batch, in_features, 4), dtype=jnp.float32)

    out = jax.block_until_ready(fourvec_linear(x, weight))
    ref = jnp.einsum("oi,bif->bof", weight, x)
    assert out.shape == (batch, out_features, 4)
    assert jnp.allclose(out, ref, atol=1e-5, rtol=1e-5)

    # --- skinny-M swap path (B*4 < 128, O >= 128), odd sizes --------------
    b2, i2, o2 = 4, 48, 160
    w2 = init_weight(k_w2, o2, i2)
    x2 = jax.random.normal(k_x2, (b2, i2, 4), dtype=jnp.float32)
    out2 = jax.block_until_ready(fourvec_linear(x2, w2))
    ref2 = jnp.einsum("oi,bif->bof", w2, x2)
    assert out2.shape == (b2, o2, 4)
    assert jnp.allclose(out2, ref2, atol=1e-5, rtol=1e-5)

    # --- multi-k accumulation kernel (direct unit test) --------------------
    A = jax.random.normal(k_a, (128, 512), dtype=jnp.float32)
    Bm = jax.random.normal(k_b, (512, 128), dtype=jnp.float32)
    mm = jax.block_until_ready(_tiled_matmul_f32(A, Bm, tm=128, tn=128, tk=128))
    assert jnp.allclose(mm, A @ Bm, atol=1e-4, rtol=1e-5)

    print("KERNEL_OK")
</pallas_src>

<mosaic_0001>
module attributes {stable_mosaic.version = 11 : i64} {
  func.func @_mm_kernel_single_k(%arg0: i32, %arg1: i32, %arg2: memref<8x128xf32, #tpu.memory_space<vmem>>, %arg3: memref<128x128xf32, #tpu.memory_space<vmem>>, %arg4: memref<8x128xf32, #tpu.memory_space<vmem>>) attributes {dimension_semantics = [#tpu.dimension_semantics<parallel>, #tpu.dimension_semantics<parallel>], iteration_bounds = array<i64: 1, 1>, scalar_prefetch = 0 : i64, scratch_operands = 0 : i64, tpu.core_type = #tpu.core_type<tc>, window_params = [{transform_indices = @transform_0, window_bounds = array<i64: 8, 128>}, {transform_indices = @transform_1, window_bounds = array<i64: 128, 128>}, {transform_indices = @transform_2, window_bounds = array<i64: 8, 128>}]} {
    %c0 = arith.constant 0 : index
    %c0_0 = arith.constant 0 : index
    %0 = vector.load %arg2[%c0, %c0_0] : memref<8x128xf32, #tpu.memory_space<vmem>>, vector<8x128xf32>
    %c0_1 = arith.constant 0 : index
    %c0_2 = arith.constant 0 : index
    %1 = vector.load %arg3[%c0_1, %c0_2] : memref<128x128xf32, #tpu.memory_space<vmem>>, vector<128x128xf32>
    %cst = arith.constant dense<0.000000e+00> : vector<8x128xf32>
    %2 = tpu.matmul %0, %1, %cst {dimension_numbers = #tpu.dot_dimension_numbers<[1], [0], [0], [1], [0, 0, 1, 1], [], []>} : vector<8x128xf32>, vector<128x128xf32>, vector<8x128xf32> -> vector<8x128xf32>
    %c0_3 = arith.constant 0 : index
    %c0_4 = arith.constant 0 : index
    %3 = vector.load %arg4[%c0_3, %c0_4] : memref<8x128xf32, #tpu.memory_space<vmem>>, vector<8x128xf32>
    tpu.vector_store %arg4[%c0_3, %c0_4], %2 {strides = array<i32>} : memref<8x128xf32, #tpu.memory_space<vmem>>, vector<8x128xf32>,
    return
  }
  func.func @transform_0(%arg0: i32, %arg1: i32) -> (i32, i32) {
    %c0_i32 = arith.constant 0 : i32
    %c0_i32_0 = arith.constant 0 : i32
    return %arg0, %c0_i32 : i32, i32
  }
  func.func @transform_1(%arg0: i32, %arg1: i32) -> (i32, i32) {
    %c0_i32 = arith.constant 0 : i32
    %c0_i32_0 = arith.constant 0 : i32
    return %c0_i32, %arg1 : i32, i32
  }
  func.func @transform_2(%arg0: i32, %arg1: i32) -> (i32, i32) {
    %c0_i32 = arith.constant 0 : i32
    return %arg0, %arg1 : i32, i32
  }
}

</mosaic_0001>

<bundles_post_ra>
// kernel: tpu_custom_call.1
= control target key start
LH: loop header
LB: loop body
LE: loop exit
PB: predicated region body
PF: predicated region fallthrough
CT: control target
= control target key end

     0   :  { %7 = vsyncpa [#allocation3], 0  ;;  %s364_s0 = inlined_call_operand.hbm [shape: f32[8,128], index: 0, kind: input, shape index: {}]   ;;  %s365_s1 = inlined_call_operand.hbm [shape: f32[128,128], index: 1, kind: input, shape index: {}]   ;;  %s366_s2 = inlined_call_operand.hbm [shape: f32[8,128], index: 2, kind: output, shape index: {}]  }
   0x1   :  { %8 = vsyncpa [#allocation6], 0 }
   0x2   :  { %9 = vsyncpa [#allocation4], 0  ;;  %s298_s9 = smov [#allocation2]   ;;  %s299_s11 = smov [#allocation5]  }
   0x3   :  { %s16_s10 = sshll.u32 %s298_s9, 4  ;;  %s25_s12 = sshll.u32 %s299_s11, 4  ;;  %s17_s10 = int_to_ptr.vmem [resolvable:$true] %s16_s10  ;;  %s321_s12 = int_to_ptr.vmem [resolvable:$true] %s25_s12 }
   0x4   :  { %s226_s15 = scalar_lea.hbm %s364_s0, 128 }
   0x5   :  { %p227_p0 = scmp.ne.s32.totalorder %s364_s0, %s226_s15  ;;  %p230_p1 = scmp.lt.u32.totalorder %s226_s15, %s364_s0 }
   0x7   :  { %p232_p2 = pnand %p230_p1, %p227_p0 }
   0x9   :  { %235 = shalt.err (!%p232_p2)
}
   0xa   :  { %s236_s20 = scalar_lea.vmem %s17_s10, 128  ;;  %p241_p4 = scmp.lt.s32.totalorder %s17_s10, %s17_s10 }
   0xb   :  { %p237_p3 = scmp.ne.s32.totalorder %s17_s10, %s236_s20  ;;  %p242_p5 = scmp.lt.s32.totalorder %s236_s20, %s236_s20 }
   0xd   :  { %p243_p6 = por %p242_p5, %p241_p4 }
   0xf   :  { %p244_p7 = pnand %p243_p6, %p237_p3 }
  0x11   :  { %247 = shalt.err (!%p244_p7)
}
  0x12   :  { %19 = dma.hbm_to_vmem [thread:$0]  %s364_s0, 128, %s17_s10, [#allocation3]  }
  0x13   :  { %s248_s25 = scalar_lea.hbm %s365_s1, 2048 }
  0x14   :  { %p249_p8 = scmp.ne.s32.totalorder %s365_s1, %s248_s25  ;;  %p252_p9 = scmp.lt.u32.totalorder %s248_s25, %s365_s1 }
  0x16   :  { %p254_p10 = pnand %p252_p9, %p249_p8 }
  0x18   :  { %257 = shalt.err (!%p254_p10)
}
  0x19   :  { %s258_s30 = scalar_lea.vmem %s321_s12, 2048  ;;  %p263_p12 = scmp.lt.s32.totalorder %s321_s12, %s321_s12 }
  0x1a   :  { %p259_p11 = scmp.ne.s32.totalorder %s321_s12, %s258_s30  ;;  %p264_p13 = scmp.lt.s32.totalorder %s258_s30, %s258_s30 }
  0x1c   :  { %p265_p0 = por %p264_p13, %p263_p12 }
  0x1e   :  { %p266_p1 = pnand %p265_p0, %p259_p11 }
  0x20   :  { %269 = shalt.err (!%p266_p1)
}
  0x21   :  { %s300_s0 = smov 128   ;;  %s301_s3 = smov 8  }
  0x22   :  { %31 = dma.hbm_to_vmem [thread:$0]  %s365_s1, 2048, %s321_s12, [#allocation6], %s300_s0, %s300_s0, %s301_s3  }
  0x23   :  { %292 = dma.done.wait [#allocation3], 128  }
  0x24   :  { %293 = vsyncadd [#allocation3], 4294967168 }
  0x25   :  { %294 = dma.done.wait [#allocation6], 2048  }
  0x26   :  { %295 = vsyncadd [#allocation6], 4294965248  ;;  %v302_v0 = vmov 0.0|0.0   ;;  %vm303_vm0 = vmmov 0   ;;  %v304_v1 = vmov 0.0   ;;  %v39_v2 = vld [vmem:[#allocation5] sm:$0xff] }
  0x27   :  { %194 = vmatprep.subr.bf16.mxu0 %v302_v0  ;;  %191 = vmatprep.mubr.msk.f32.mxu0 %vm303_vm0, %v304_v1  ;;  %v40_v3 = vld [vmem:[#allocation5 + $0x8] sm:$0xff]  ;;  %v41_v4 = vld [vmem:[#allocation5 + $0x10] sm:$0xff]  ;;  %v42_v6 = vld [vmem:[#allocation5 + $0x18] sm:$0xff]  ;;  %s305_s1 = smov [#allocation7]  }
  0x28   :  { %v195_v5 = vpack.c.bf16 %v40_v3, %v39_v2  ;;  %v198_v7 = vpack.c.bf16 %v42_v6, %v41_v4  ;;  %v43_v8 = vld [vmem:[#allocation5 + $0x20] sm:$0xff]  ;;  %v44_v9 = vld [vmem:[#allocation5 + $0x28] sm:$0xff]  ;;  %v45_v11 = vld [vmem:[#allocation5 + $0x30] sm:$0xff]  ;;  %s132_s6 = sshll.u32 %s305_s1, 4  ;;  %s133_s6 = int_to_ptr.vmem [resolvable:$true] %s132_s6 }
  0x29   :  { %v201_v10 = vpack.c.bf16 %v44_v9, %v43_v8  ;;  %v46_v12 = vld [vmem:[#allocation5 + $0x38] sm:$0xff]  ;;  %v47_v14 = vld [vmem:[#allocation5 + $0x40] sm:$0xff]  ;;  %v48_v15 = vld [vmem:[#allocation5 + $0x48] sm:$0xff]  ;;  %s270_s7 = scalar_lea.vmem %s133_s6, 128  ;;  %p275_p3 = scmp.lt.s32.totalorder %s133_s6, %s133_s6 }
  0x2a   :  { %196 = vmatpush3.bf16.msra.mxu0 %v195_v5  ;;  %v204_v13 = vpack.c.bf16 %v46_v12, %v45_v11  ;;  %v207_v16 = vpack.c.bf16 %v48_v15, %v47_v14  ;;  %v49_v17 = vld [vmem:[#allocation5 + $0x50] sm:$0xff]  ;;  %v50_v18 = vld [vmem:[#allocation5 + $0x58] sm:$0xff]  ;;  %v51_v20 = vld [vmem:[#allocation5 + $0x60] sm:$0xff]  ;;  %p271_p2 = scmp.ne.s32.totalorder %s133_s6, %s270_s7  ;;  %p276_p4 = scmp.lt.s32.totalorder %s270_s7, %s270_s7 }
  0x2b   :  { %197 = vmatprep.subr.bf16.mxu0 %v302_v0  ;;  %v210_v19 = vpack.c.bf16 %v50_v18, %v49_v17  ;;  %v52_v21 = vld [vmem:[#allocation5 + $0x68] sm:$0xff]  ;;  %v53_v23 = vld [vmem:[#allocation5 + $0x70] sm:$0xff]  ;;  %v54_v24 = vld [vmem:[#allocation5 + $0x78] sm:$0xff] }
  0x2c   :  { %v213_v22 = vpack.c.bf16 %v52_v21, %v51_v20  ;;  %v216_v25 = vpack.c.bf16 %v54_v24, %v53_v23  ;;  %v38_v26 = vld [vmem:[#allocation2] sm:$0xff]  ;;  %p277_p5 = por %p276_p4, %p275_p3 }
  0x2e   :  { %199 = vmatpush3.bf16.msra.mxu0 %v198_v7  ;;  %p278_p6 = pnand %p277_p5, %p271_p2 }
  0x2f   :  { %200 = vmatprep.subr.bf16.mxu0 %v302_v0 }
  0x32   :  { %202 = vmatpush3.bf16.msra.mxu0 %v201_v10 }
  0x33   :  { %203 = vmatprep.subr.bf16.mxu0 %v302_v0 }
  0x36   :  { %205 = vmatpush3.bf16.msra.mxu0 %v204_v13 }
  0x37   :  { %206 = vmatprep.subr.bf16.mxu0 %v302_v0 }
  0x3a   :  { %208 = vmatpush3.bf16.msra.mxu0 %v207_v16 }
  0x3b   :  { %209 = vmatprep.subr.bf16.mxu0 %v302_v0 }
  0x3e   :  { %211 = vmatpush3.bf16.msra.mxu0 %v210_v19 }
  0x3f   :  { %212 = vmatprep.subr.bf16.mxu0 %v302_v0 }
  0x42   :  { %214 = vmatpush3.bf16.msra.mxu0 %v213_v22 }
  0x43   :  { %215 = vmatprep.subr.bf16.mxu0 %v302_v0 }
  0x46   :  { %217 = vmatpush3.bf16.msra.mxu0 %v216_v25 }
  0x49   :  { %192 = vmatmul.mubr.f32.vlgmr.msra.gmra.mrb[0].mxu0 %v38_v26 }
 0x11c   :  { %v121_v27 = vpop.f32.mrb[0].mxu0 }
 0x11d   :  { %125 = vst [vmem:[#allocation7] sm:$0xff] %v121_v27  ;;  %v193_v28 = vpop.f32.mrb[1].mxu0 }
 0x11e   :  { %281 = shalt.err (!%p278_p6)
}
 0x11f   :  { %s282_s10 = scalar_lea.hbm %s366_s2, 128 }
 0x120   :  { %p283_p7 = scmp.ne.s32.totalorder %s366_s2, %s282_s10  ;;  %p286_p8 = scmp.lt.u32.totalorder %s282_s10, %s366_s2 }
 0x122   :  { %p288_p9 = pnand %p286_p8, %p283_p7 }
 0x124   :  { %291 = shalt.err (!%p288_p9)
}
 0x125   :  { %135 = dma.vmem_to_hbm [thread:$0]  %s133_s6, 128, %s366_s2, [#allocation4]  }
 0x126   :  { %296 = dma.done.wait [#allocation4], 128  }
 0x127   :  { %297 = vsyncadd [#allocation4], 4294967168 }
 0x128   :  { %139 = vsyncpa [#allocation3], 1 }
 0x129   :  { %140 = vsyncpa [#allocation6], 1 }
 0x12a   :  { %141 = vsyncpa [#allocation4], 1 }

</bundles_post_ra>
